<compile_context>
chip_gen: v5e
topology: v5e:2x2
jax: 0.10.0
libtpu: 0.0.40
codegen_flags: <defaults>
</compile_context>

<pallas_src>
import math
from functools import lru_cache

import jax
import jax.numpy as jnp
from jax.experimental import pallas as pl
from jax.experimental.pallas import tpu as pltpu

# TODO(synk): `pe_scaling` is an undefined free variable in the reference
# module's _generate_pe; it is pinned to 1.0 here as a documented deviation.
PE_SCALING = 1.0

_LANE = 128


def generate_pe(max_len: int, d_model: int, dtype=jnp.float32) -> jnp.ndarray:
    """Reproduce PositionalEncoding._generate_pe, shape (1, max_len, d_model)."""
    position = jnp.arange(0, max_len, dtype=jnp.float32)[:, None]              # (L, 1)
    div_term = jnp.exp(
        jnp.arange(0, d_model, 2, dtype=jnp.float32) * (-math.log(10000.0) / d_model)
    )                                                                           # (D/2,)
    ang = position * div_term                                                   # (L, D/2)
    pe = jnp.zeros((max_len, d_model), dtype=jnp.float32)
    pe = pe.at[:, 0::2].set(jnp.sin(ang))
    pe = pe.at[:, 1::2].set(jnp.cos(ang))
    pe = (pe + 1.0) / 2.0
    pe = PE_SCALING * pe
    return pe[None, :, :].astype(dtype)                                         # (1, L, D)


def _pe_add_kernel(x_ref, pe_ref, o_ref):
    # Same-shaped (1, TR, C) blocks -> one VPU add per vreg.  The pe dtype cast
    # rides the idle VALU slots instead of being a separate wrapper-side pass.
    o_ref[...] = x_ref[...] + pe_ref[...].astype(o_ref.dtype)


@lru_cache(maxsize=None)
def _chip_config():
    """(target block bytes, scoped VMEM limit bytes) per TPU generation."""
    vmem_cap = None
    try:
        info = pltpu.get_tpu_info()
        for name in ("vmem_capacity_bytes", "vmem_size_bytes", "vmem_bytes"):
            val = getattr(info, name, None)
            if val:
                vmem_cap = int(val)
                break
    except Exception:
        pass
    if vmem_cap is None:
        vmem_cap = 64 << 20  # assume the tightest budget (v7x)
    if vmem_cap >= (128 << 20):
        # v5e / v6e (128 MiB physical VMEM): 8 MiB blocks halve grid-step
        # overhead; raise the scoped limit past the 2*(x+pe+out) = 48 MiB
        # pipeline footprint (v5e's default scoped limit is only 16 MiB).
        return 8 << 20, 64 << 20
    # v7x (64 MiB physical / 32 MiB default scoped): 4 MiB blocks -> <= 24 MiB.
    return 4 << 20, 32 << 20


def _sublane_rows(itemsize: int) -> int:
    # Packed-sublane row granularity: f32 -> 8, bf16 -> 16, int8/fp8 -> 32.
    return max(8, 32 // max(itemsize, 1))


def _row_tile(R, C, itemsize, target_bytes, sub, must_align):
    """Row-tile height.  `must_align` forces TR % sub == 0, needed when the pe
    table keeps its full max_len rows (TR == R is not 'full dim' for pe then)."""
    budget_rows = max(target_bytes // (C * itemsize), 1)
    if R <= budget_rows and not must_align:
        return int(R)  # whole per-batch plane in one block (full dim, always legal)
    tr = (min(R, budget_rows) // sub) * sub
    if tr == 0:
        tr = sub if (must_align or sub <= R) else R
    return int(tr)


@jax.jit
def positional_encoding_forward(x: jnp.ndarray, pe: jnp.ndarray) -> jnp.ndarray:
    """x: (B, S, D); pe: (1, max_len, D). Returns x + pe[:, :S, :] in x.dtype."""
    B, S, D = x.shape
    max_len = pe.shape[1]
    if S > max_len:
        raise ValueError(f"sequence length {S} exceeds positional table max_len {max_len}")

    sub = max(_sublane_rows(x.dtype.itemsize), _sublane_rows(pe.dtype.itemsize))

    if D % _LANE == 0:
        # Already lane-dense: stream x and the full pe table untouched; the
        # index_map picks out row tiles below S and the kernel casts pe.
        R, C = S, D
        x2 = x
        if S >= sub or S == max_len:
            pe2 = pe
        else:
            # Tiny S with S != max_len: no sublane-aligned common tile exists,
            # so take a cheap static slice to make the row dims match.
            pe2 = pe[:, :S, :]
    elif (S * D) % _LANE == 0:
        # Flatten the per-batch plane to a (R, 128) lane-dense view; pe must be
        # sliced/reshaped once to match (small one-time pass over the table).
        R, C = (S * D) // _LANE, _LANE
        x2 = x.reshape(B, R, C)
        pe2 = pe[:, :S, :].reshape(1, R, C)
    else:
        # TODO(synk): neither D nor S*D is a multiple of 128 -> masked partial
        # stores (correct, just slower).
        R, C = S, D
        x2 = x
        pe2 = pe if (S >= sub or S == max_len) else pe[:, :S, :]

    must_align = pe2.shape[1] != R
    target_bytes, vmem_limit = _chip_config()
    itemsize = max(x.dtype.itemsize, pe.dtype.itemsize)
    TR = _row_tile(R, C, itemsize, target_bytes, sub, must_align)
    grid = (pl.cdiv(R, TR), B)

    out2 = pl.pallas_call(
        _pe_add_kernel,
        out_shape=jax.ShapeDtypeStruct((B, R, C), x.dtype),
        grid=grid,
        in_specs=[
            pl.BlockSpec((1, TR, C), lambda s, b: (b, s, 0)),
            # B innermost: pe's block index is constant across the inner axis,
            # so the shared tile is DMA'd once per row tile, not per (s, b).
            pl.BlockSpec((1, TR, C), lambda s, b: (0, s, 0)),
        ],
        out_specs=pl.BlockSpec((1, TR, C), lambda s, b: (b, s, 0)),
        compiler_params=pltpu.CompilerParams(
            dimension_semantics=("parallel", "parallel"),
            vmem_limit_bytes=vmem_limit,
        ),
    )(x2, pe2)

    return out2.reshape(B, S, D)


if __name__ == "__main__":
    B, S, D = 2, 8, 32
    MAX_LEN = 16

    key = jax.random.PRNGKey(0)
    x = jax.random.normal(key, (B, S, D), dtype=jnp.float32)

    pe = generate_pe(MAX_LEN, D)  # deterministic "registered buffer"

    out = positional_encoding_forward(x, pe)
    out = jax.block_until_ready(out)

    # Reference check in plain JAX (same semantics as the PyTorch forward).
    ref = x + pe[:, :S, :]
    assert out.shape == (B, S, D)
    assert jnp.allclose(out, ref, atol=1e-6, rtol=1e-6)

    print("KERNEL_OK")
</pallas_src>

<mosaic_0001>
module attributes {stable_mosaic.version = 11 : i64} {
  func.func @_pe_add_kernel(%arg0: i32, %arg1: i32, %arg2: memref<1x2x128xf32, #tpu.memory_space<vmem>>, %arg3: memref<1x2x128xf32, #tpu.memory_space<vmem>>, %arg4: memref<1x2x128xf32, #tpu.memory_space<vmem>>) attributes {dimension_semantics = [#tpu.dimension_semantics<parallel>, #tpu.dimension_semantics<parallel>], iteration_bounds = array<i64: 1, 2>, scalar_prefetch = 0 : i64, scratch_operands = 0 : i64, tpu.core_type = #tpu.core_type<tc>, window_params = [{transform_indices = @transform_0, window_bounds = array<i64: 1, 2, 128>}, {transform_indices = @transform_1, window_bounds = array<i64: 1, 2, 128>}, {transform_indices = @transform_2, window_bounds = array<i64: 1, 2, 128>}]} {
    %c0 = arith.constant 0 : index
    %c0_0 = arith.constant 0 : index
    %c0_1 = arith.constant 0 : index
    %0 = vector.load %arg2[%c0, %c0_0, %c0_1] : memref<1x2x128xf32, #tpu.memory_space<vmem>>, vector<1x2x128xf32>
    %c0_2 = arith.constant 0 : index
    %c0_3 = arith.constant 0 : index
    %c0_4 = arith.constant 0 : index
    %1 = vector.load %arg3[%c0_2, %c0_3, %c0_4] : memref<1x2x128xf32, #tpu.memory_space<vmem>>, vector<1x2x128xf32>
    %2 = arith.addf %0, %1 : vector<1x2x128xf32>
    %c0_5 = arith.constant 0 : index
    %c0_6 = arith.constant 0 : index
    %c0_7 = arith.constant 0 : index
    %3 = vector.load %arg4[%c0_5, %c0_6, %c0_7] : memref<1x2x128xf32, #tpu.memory_space<vmem>>, vector<1x2x128xf32>
    tpu.vector_store %arg4[%c0_5, %c0_6, %c0_7], %2 {strides = array<i32>} : memref<1x2x128xf32, #tpu.memory_space<vmem>>, vector<1x2x128xf32>,
    return
  }
  func.func @transform_0(%arg0: i32, %arg1: i32) -> (i32, i32, i32) {
    %c0_i32 = arith.constant 0 : i32
    %c0_i32_0 = arith.constant 0 : i32
    return %arg1, %arg0, %c0_i32 : i32, i32, i32
  }
  func.func @transform_1(%arg0: i32, %arg1: i32) -> (i32, i32, i32) {
    %c0_i32 = arith.constant 0 : i32
    %c0_i32_0 = arith.constant 0 : i32
    %c0_i32_1 = arith.constant 0 : i32
    return %c0_i32, %arg0, %c0_i32_0 : i32, i32, i32
  }
  func.func @transform_2(%arg0: i32, %arg1: i32) -> (i32, i32, i32) {
    %c0_i32 = arith.constant 0 : i32
    %c0_i32_0 = arith.constant 0 : i32
    return %arg1, %arg0, %c0_i32 : i32, i32, i32
  }
}

</mosaic_0001>

<bundles_post_ra>
// kernel: positional_encoding_forward.1
= control target key start
LH: loop header
LB: loop body
LE: loop exit
PB: predicated region body
PF: predicated region fallthrough
CT: control target
= control target key end

     0   :  { %s354_s9 = smov 0   ;;  %s331_s10 = smov 0   ;;  %s368_s0 = inlined_call_operand.vmem [shape: f32[2,2,128], index: 0, kind: input, shape index: {}]   ;;  %s369_s1 = inlined_call_operand.vmem [shape: f32[1,2,128], index: 1, kind: input, shape index: {}]   ;;  %s370_s2 = inlined_call_operand.vmem [shape: f32[2,2,128], index: 2, kind: output, shape index: {}]  }
   0x1   :  { %s335_s11 = smov 0  }
   0x2 LB: > { %s21_s12 = sadd.s32 1, %s333_s10  ;;  %p286_p0 = scmp.ge.s32.totalorder %s337_s11, 1  ;;  %s337_s11 = sphi %s335_s11, %s12_s11   ;;  %s333_s10 = sphi %s331_s10, %s332_s10   ;;  %s329_s9 = sphi %s354_s9, %s371_s9  }
   0x3   : > { %p22_p1 = scmp.ge.s32.totalorder %s21_s12, 2  ;;  %p139_p2 = scmp.lt.s32.totalorder %s337_s11, 3 }
   0x5   : > { %s373_s12 = smov (%p22_p1, %s21_s12), 0  ;;  %p140_p3 = pnand %p286_p0, %p139_p2 }
   0x6   : > { %p169_p4 = scmp.lt.s32.totalorder (!%p140_p3), %s329_s9, 1 }
   0x7   : > { %143 = sbr.rel (%p140_p3) target bundleno = 19 (0x13), region = 28 }
   0xc   : > { %s375_s9 = smov (!%p169_p4, %s329_s9), 1  ;;  %v188_v0 = vld [vmem:[%s369_s1] sm:$0x3] }
   0xd   : > { %s287_s13 = sshll.u32 %s375_s9, 1 }
   0xe   : > { %s175_s18 = scalar_lea.vmem %s368_s0, %s287_s13  ;;  %s186_s21 = scalar_lea.vmem %s370_s2, %s287_s13 }
   0xf   : > { %v187_v1 = vld [vmem:[%s175_s18] sm:$0x3] }
  0x10   : > { %v189_v2 = vadd.f32 %v188_v0, %v187_v1 }
  0x12   : > { %190 = vst [vmem:[%s186_s21] sm:$0x3] %v189_v2 }
  0x13 PF: > { %s12_s11 = sadd.s32 1, %s337_s11   ;;  %s371_s9 = smov %s333_s10 }
  0x14   : > { %p9_p5 = scmp.ge.s32.totalorder %s12_s11, 4   ;;  %s332_s10 = smov %s373_s12  }
  0x16   :  { %11 = sbr.rel (!%p9_p5) target bundleno = 2 (0x2), region = 61 }

</bundles_post_ra>
